<compile_context>
chip_gen: v6e
topology: v6e:2x2x1
jax: 0.10.0
libtpu: 0.0.40
codegen_flags: <defaults>
</compile_context>

<pallas_src>
import functools

import jax
import jax.numpy as jnp
from jax.experimental import pallas as pl
from jax.experimental.pallas import tpu as pltpu


def _truncation_kernel(x_ref, avg_ref, o_ref, *, threshold, max_layer, num_layers):
    # x_ref/o_ref: (tb, L, D)   avg_ref: (1, 1, D)
    x = x_ref[...]
    avg = avg_ref[...]
    # torch.lerp(avg, x, t) == avg + t * (x - avg)
    interp = avg + threshold * (x - avg)

    if max_layer >= num_layers:
        # Statically: every layer is truncated -> plain lerp, no mask.
        res = interp
    elif max_layer <= 0:
        # Statically: nothing is truncated -> pass-through.
        res = x
    else:
        # Block covers the full layer axis, so the layer index is just the
        # position along dim 1 (no program_id offset needed).
        layer_ids = jax.lax.broadcasted_iota(jnp.int32, x.shape, dimension=1)
        res = jnp.where(layer_ids < max_layer, interp, x)

    o_ref[...] = res.astype(o_ref.dtype)


def _pick_batch_tile(batch, layers, dim, itemsize):
    """Largest divisor of `batch` whose (tb, L, D) block stays under ~2 MiB."""
    budget = 2 * 1024 * 1024
    per_sample = max(layers * dim * itemsize, 1)
    max_tb = max(1, min(batch, budget // per_sample, 512))
    tb = 1
    for cand in range(1, int(max_tb) + 1):
        if batch % cand == 0:
            tb = cand
    return tb
    # TODO(synk): if a single sample (L*D) ever exceeds the VMEM budget,
    # additionally tile the dlatent axis in 128-lane multiples.


def truncation_pallas(x, avg_latent, *, max_layer=8, threshold=0.7):
    """x: (B, L, D); avg_latent broadcastable to (D,). Returns (B, L, D)."""
    assert x.ndim == 3, "Truncation expects a rank-3 input (B, layers, dlatent)"
    B, L, D = x.shape

    # Broadcast the average latent to a (1, 1, D) block (standard StyleGAN
    # keeps a single (D,) running average of W).
    avg3 = jnp.broadcast_to(jnp.asarray(avg_latent, dtype=x.dtype), (1, 1, D))

    tb = _pick_batch_tile(B, L, D, jnp.dtype(x.dtype).itemsize)
    grid = (B // tb,)

    kernel = functools.partial(
        _truncation_kernel,
        threshold=float(threshold),
        max_layer=int(max_layer),
        num_layers=L,
    )

    return pl.pallas_call(
        kernel,
        out_shape=jax.ShapeDtypeStruct((B, L, D), x.dtype),
        grid=grid,
        in_specs=[
            pl.BlockSpec((tb, L, D), lambda i: (i, 0, 0)),
            pl.BlockSpec((1, 1, D), lambda i: (0, 0, 0)),
        ],
        out_specs=pl.BlockSpec((tb, L, D), lambda i: (i, 0, 0)),
        compiler_params=pltpu.CompilerParams(
            dimension_semantics=("parallel",),
        ),
    )(x, avg3)


class Truncation:
    """JAX/Pallas port of the PyTorch `Truncation` module."""

    def __init__(self, avg_latent, max_layer=8, threshold=0.7):
        self.max_layer = int(max_layer)
        self.threshold = float(threshold)
        self.avg_latent = jnp.asarray(avg_latent)

    def __call__(self, x):
        return truncation_pallas(
            x, self.avg_latent, max_layer=self.max_layer, threshold=self.threshold
        )


if __name__ == "__main__":
    key = jax.random.PRNGKey(0)
    xkey, akey = jax.random.split(key)

    # Small StyleGAN-like shapes: 2 samples, 16 style layers, 128-dim latent
    # (lane-dense last dim). max_layer=8 -> layers 0..7 truncated, 8..15 not.
    batch, num_layers, dlatent = 2, 16, 128
    max_layer, threshold = 8, 0.7

    x = jax.random.normal(xkey, (batch, num_layers, dlatent), dtype=jnp.float32)
    avg_latent = jax.random.normal(akey, (dlatent,), dtype=jnp.float32)

    trunc = Truncation(avg_latent, max_layer=max_layer, threshold=threshold)
    out = jax.block_until_ready(trunc(x))

    # Pure-JAX reference of the exact PyTorch semantics.
    interp_ref = avg_latent + threshold * (x - avg_latent)
    do_trunc = (jnp.arange(num_layers) < max_layer)[None, :, None]
    ref = jnp.where(do_trunc, interp_ref, x)

    assert out.shape == (batch, num_layers, dlatent)
    assert jnp.allclose(out, ref, atol=1e-6, rtol=1e-6), "mismatch vs reference"

    print("KERNEL_OK")
</pallas_src>

<mosaic_0001>
module attributes {stable_mosaic.version = 11 : i64} {
  func.func @_truncation_kernel(%arg0: i32, %arg1: memref<2x16x128xf32, #tpu.memory_space<vmem>>, %arg2: memref<1x1x128xf32, #tpu.memory_space<vmem>>, %arg3: memref<2x16x128xf32, #tpu.memory_space<vmem>>) attributes {dimension_semantics = [#tpu.dimension_semantics<parallel>], iteration_bounds = array<i64: 1>, scalar_prefetch = 0 : i64, scratch_operands = 0 : i64, tpu.core_type = #tpu.core_type<tc>, window_params = [{transform_indices = @transform_0, window_bounds = array<i64: 2, 16, 128>}, {pipeline_mode = #tpu.pipeline_mode<synchronous>, transform_indices = @transform_1, window_bounds = array<i64: 1, 1, 128>}, {transform_indices = @transform_2, window_bounds = array<i64: 2, 16, 128>}]} {
    %c0 = arith.constant 0 : index
    %c0_0 = arith.constant 0 : index
    %c0_1 = arith.constant 0 : index
    %0 = vector.load %arg1[%c0, %c0_0, %c0_1] : memref<2x16x128xf32, #tpu.memory_space<vmem>>, vector<2x16x128xf32>
    %c0_2 = arith.constant 0 : index
    %c0_3 = arith.constant 0 : index
    %c0_4 = arith.constant 0 : index
    %1 = vector.load %arg2[%c0_2, %c0_3, %c0_4] : memref<1x1x128xf32, #tpu.memory_space<vmem>>, vector<1x1x128xf32>
    %2 = vector.broadcast %1 : vector<1x1x128xf32> to vector<2x16x128xf32>
    %3 = arith.subf %0, %2 : vector<2x16x128xf32>
    %cst = arith.constant 0.699999988 : f32
    %4 = vector.broadcast %cst : f32 to vector<2x16x128xf32>
    %5 = arith.mulf %4, %3 : vector<2x16x128xf32>
    %6 = vector.broadcast %1 : vector<1x1x128xf32> to vector<2x16x128xf32>
    %7 = arith.addf %6, %5 : vector<2x16x128xf32>
    %8 = tpu.iota {dimensions = array<i32: 1>} : vector<2x16x128xi32>
    %c8_i32 = arith.constant 8 : i32
    %9 = vector.broadcast %c8_i32 : i32 to vector<2x16x128xi32>
    %10 = arith.cmpi slt, %8, %9 : vector<2x16x128xi32>
    %11 = arith.select %10, %7, %0 : vector<2x16x128xi1>, vector<2x16x128xf32>
    %c0_5 = arith.constant 0 : index
    %c0_6 = arith.constant 0 : index
    %c0_7 = arith.constant 0 : index
    %12 = vector.load %arg3[%c0_5, %c0_6, %c0_7] : memref<2x16x128xf32, #tpu.memory_space<vmem>>, vector<2x16x128xf32>
    tpu.vector_store %arg3[%c0_5, %c0_6, %c0_7], %11 {strides = array<i32>} : memref<2x16x128xf32, #tpu.memory_space<vmem>>, vector<2x16x128xf32>,
    return
  }
  func.func @transform_0(%arg0: i32) -> (i32, i32, i32) {
    %c0_i32 = arith.constant 0 : i32
    %c0_i32_0 = arith.constant 0 : i32
    %c0_i32_1 = arith.constant 0 : i32
    return %arg0, %c0_i32, %c0_i32_0 : i32, i32, i32
  }
  func.func @transform_1(%arg0: i32) -> (i32, i32, i32) {
    %c0_i32 = arith.constant 0 : i32
    %c0_i32_0 = arith.constant 0 : i32
    %c0_i32_1 = arith.constant 0 : i32
    %c0_i32_2 = arith.constant 0 : i32
    return %c0_i32, %c0_i32_0, %c0_i32_1 : i32, i32, i32
  }
  func.func @transform_2(%arg0: i32) -> (i32, i32, i32) {
    %c0_i32 = arith.constant 0 : i32
    %c0_i32_0 = arith.constant 0 : i32
    %c0_i32_1 = arith.constant 0 : i32
    return %arg0, %c0_i32, %c0_i32_0 : i32, i32, i32
  }
}

</mosaic_0001>

<bundles_post_ra>
// kernel: tpu_custom_call.1
= control target key start
LH: loop header
LB: loop body
LE: loop exit
PB: predicated region body
PF: predicated region fallthrough
CT: control target
= control target key end

     0   :  { %7 = vsyncpa [#allocation3], 0  ;;  %s162_s0 = inlined_call_operand.hbm [shape: f32[2,16,128], index: 0, kind: input, shape index: {}]   ;;  %s163_s1 = inlined_call_operand.vmem [shape: f32[1,1,128], index: 1, kind: input, shape index: {}]   ;;  %s164_s2 = inlined_call_operand.hbm [shape: f32[2,16,128], index: 2, kind: output, shape index: {}]  }
   0x1   :  { %8 = vsyncpa [#allocation4], 0  ;;  %s128_s9 = smov [#allocation2]  }
   0x2   :  { %s14_s10 = sshll.u32 %s128_s9, 4  ;;  %s15_s10 = int_to_ptr.vmem [resolvable:$true] %s14_s10 }
   0x3   :  { %s92_s11 = scalar_lea.vmem %s15_s10, 512  ;;  %p97_p1 = scmp.lt.s32.totalorder %s15_s10, %s15_s10 }
   0x4   :  { %p93_p0 = scmp.ne.s32.totalorder %s15_s10, %s92_s11  ;;  %p98_p2 = scmp.lt.s32.totalorder %s92_s11, %s92_s11 }
   0x6   :  { %p99_p3 = por %p98_p2, %p97_p1 }
   0x8   :  { %p100_p4 = pnand %p99_p3, %p93_p0 }
   0xa   :  { %103 = shalt.err (!%p100_p4)
}
   0xb   :  { %s129_s12 = smov 128   ;;  %s130_s13 = smov 8  }
   0xc   :  { %20 = dma.hbm_to_vmem [thread:$0]  %s162_s0, 512, %s15_s10, [#allocation3], %s129_s12, %s129_s12, %s130_s13  }
   0xd   :  { %124 = dma.done.wait [#allocation3], 512  }
   0xe   :  { %125 = vsyncadd [#allocation3], 4294966784  ;;  %v26_v0 = vld [vmem:[#allocation2] sm:$0xff]  ;;  %v27_v2 = vld [vmem:[#allocation2 + $0x8] sm:$0xff]  ;;  %s131_s18 = smov [#allocation5]  }
   0xf   :  { %v79_v1 = vld [vmem:[%s163_s1] ss:$0 sm:$0xff]  ;;  %59 = vst [vmem:[#allocation5 + $0x8] sm:$0xff] %v27_v2  ;;  %v28_v4 = vld [vmem:[#allocation2 + $0x10] sm:$0xff]  ;;  %v29_v5 = vld [vmem:[#allocation2 + $0x18] sm:$0xff]  ;;  %s67_s19 = sshll.u32 %s131_s18, 4  ;;  %s68_s19 = int_to_ptr.vmem [resolvable:$true] %s67_s19 }
  0x10   :  { %v37_v3 = vsub.f32 %v26_v0, %v79_v1  ;;  %v39_v6 = vsub.f32 %v28_v4, %v79_v1  ;;  %61 = vst [vmem:[#allocation5 + $0x18] sm:$0xff] %v29_v5  ;;  %s104_s0 = scalar_lea.vmem %s68_s19, 512  ;;  %p109_p6 = scmp.lt.s32.totalorder %s68_s19, %s68_s19 }
  0x11   :  { %p105_p5 = scmp.ne.s32.totalorder %s68_s19, %s104_s0  ;;  %p110_p7 = scmp.lt.s32.totalorder %s104_s0, %s104_s0 }
  0x12   :  { %v41_v7 = vmul.f32 0.7, %v37_v3  ;;  %v43_v8 = vmul.f32 0.7, %v39_v6 }
  0x13   :  { %p111_p8 = por %p110_p7, %p109_p6 }
  0x14   :  { %v45_v9 = vadd.f32 %v79_v1, %v41_v7  ;;  %v47_v10 = vadd.f32 %v79_v1, %v43_v8 }
  0x15   :  { %p112_p9 = pnand %p111_p8, %p105_p5 }
  0x16   :  { %58 = vst [vmem:[#allocation5] sm:$0xff] %v45_v9  ;;  %60 = vst [vmem:[#allocation5 + $0x10] sm:$0xff] %v47_v10 }
  0x17   :  { %115 = shalt.err (!%p112_p9)
}
  0x18   :  { %73 = dma.vmem_to_hbm [thread:$0]  %s68_s19, 512, %s164_s2, [#allocation4], %s129_s12, %s129_s12, %s130_s13  }
  0x19   :  { %126 = dma.done.wait [#allocation4], 512  }
  0x1a   :  { %127 = vsyncadd [#allocation4], 4294966784 }
  0x1b   :  { %77 = vsyncpa [#allocation3], 1 }
  0x1c   :  { %78 = vsyncpa [#allocation4], 1 }

</bundles_post_ra>
